<compile_context>
chip_gen: v7x
topology: tpu7x:2x2x1
jax: 0.10.0
libtpu: 0.0.40
codegen_flags: <defaults>
</compile_context>

<pallas_src>
import math

import jax
import jax.numpy as jnp
from jax.experimental import pallas as pl
from jax.experimental.pallas import tpu as pltpu


def pos_embed_kernel(x_ref, w_ref, pe_ref, o_ref):
    # x_ref: (TM, T), w_ref: (T, Dp), pe_ref: (TM, Dp)  [bias pre-folded], o_ref: (TM, Dp)
    y = jnp.dot(x_ref[...], w_ref[...], preferred_element_type=jnp.float32)
    o_ref[...] = (y + pe_ref[...]).astype(o_ref.dtype)


def _round_up(n, m):
    return ((n + m - 1) // m) * m


def positional_embedding(x, weight, bias, pe_table, *, tm=256):
    """x: (S, T) f32, weight: (D, T) f32 (nn.Linear layout), bias: (D,) f32,
    pe_table: (max_len, D) f32.  Returns (S, D) f32."""
    S, T = x.shape
    D = weight.shape[0]

    # Host-side constant precompute: fold bias into the positional slice.
    pe_b = pe_table[:S, :] + bias[None, :]                      # (S, D)

    # Lane-dense feature dim (multiple of 128) -> unmasked stores.
    D_pad = _round_up(D, 128)
    # Row tiling: TM multiple of 8 (f32 sublane), capped at the row count.
    tm = min(tm, _round_up(S, 8))
    M_pad = _round_up(S, tm)

    w_t = jnp.zeros((T, D_pad), jnp.float32).at[:, :D].set(weight.T)
    pe_bp = jnp.zeros((M_pad, D_pad), jnp.float32).at[:S, :D].set(pe_b)
    x_p = jnp.zeros((M_pad, T), jnp.float32).at[:S, :].set(x)

    grid = (M_pad // tm,)
    out = pl.pallas_call(
        pos_embed_kernel,
        out_shape=jax.ShapeDtypeStruct((M_pad, D_pad), jnp.float32),
        grid=grid,
        in_specs=[
            pl.BlockSpec((tm, T), lambda i: (i, 0)),       # x rows, tiled
            pl.BlockSpec((T, D_pad), lambda i: (0, 0)),    # weight, resident
            pl.BlockSpec((tm, D_pad), lambda i: (i, 0)),   # pe+bias, tiled
        ],
        out_specs=pl.BlockSpec((tm, D_pad), lambda i: (i, 0)),
        compiler_params=pltpu.CompilerParams(
            dimension_semantics=("parallel",)),
        cost_estimate=pl.CostEstimate(
            flops=2 * M_pad * T * D_pad,
            transcendentals=0,
            bytes_accessed=4 * (M_pad * T + T * D_pad + 2 * M_pad * D_pad)),
    )(x_p, w_t, pe_bp)

    return out[:S, :D]


def make_sinusoidal_pe(max_len, d_model):
    # Matches the PyTorch buffer construction (assumes even d_model, as the
    # original module also requires).
    position = jnp.arange(0, max_len, dtype=jnp.float32)[:, None]          # (L, 1)
    div_term = jnp.exp(jnp.arange(0, d_model, 2, dtype=jnp.float32)
                       * (-math.log(10000.0) / d_model))                   # (D/2,)
    pe = jnp.zeros((max_len, d_model), dtype=jnp.float32)
    pe = pe.at[:, 0::2].set(jnp.sin(position * div_term))
    pe = pe.at[:, 1::2].set(jnp.cos(position * div_term))
    return pe                                                               # (L, D)


if __name__ == "__main__":
    # Small deterministic setup consistent with the module.
    emg_tsteps = 16
    d_model = 32
    max_len = 128
    seq = 8  # x.size(0)

    key = jax.random.PRNGKey(0)
    k_x, k_w, k_b = jax.random.split(key, 3)

    # nn.Linear(emg_tsteps, d_model): weight (d_model, emg_tsteps), bias (d_model,)
    bound = 1.0 / math.sqrt(emg_tsteps)
    weight = jax.random.uniform(k_w, (d_model, emg_tsteps),
                                minval=-bound, maxval=bound, dtype=jnp.float32)
    bias = jax.random.uniform(k_b, (d_model,),
                              minval=-bound, maxval=bound, dtype=jnp.float32)

    pe = make_sinusoidal_pe(max_len, d_model)          # (max_len, d_model)
    x = jax.random.normal(k_x, (seq, emg_tsteps), dtype=jnp.float32)

    out = positional_embedding(x, weight, bias, pe)
    out = jax.block_until_ready(out)

    # Reference check (pure JAX, mirrors the PyTorch forward in eval mode).
    ref = x @ weight.T + bias[None, :] + pe[:seq, :]
    assert out.shape == (seq, d_model)
    assert jnp.allclose(out, ref, atol=1e-5, rtol=1e-5)

    print("KERNEL_OK")
</pallas_src>

<mosaic_0001>
module attributes {stable_mosaic.version = 11 : i64} {
  func.func @pos_embed_kernel(%arg0: i32, %arg1: memref<8x16xf32, #tpu.memory_space<vmem>>, %arg2: memref<16x128xf32, #tpu.memory_space<vmem>>, %arg3: memref<8x128xf32, #tpu.memory_space<vmem>>, %arg4: memref<8x128xf32, #tpu.memory_space<vmem>>) attributes {dimension_semantics = [#tpu.dimension_semantics<parallel>], iteration_bounds = array<i64: 1>, scalar_prefetch = 0 : i64, scratch_operands = 0 : i64, tpu.core_type = #tpu.core_type<tc>, window_params = [{transform_indices = @transform_0, window_bounds = array<i64: 8, 16>}, {pipeline_mode = #tpu.pipeline_mode<synchronous>, transform_indices = @transform_1, window_bounds = array<i64: 16, 128>}, {transform_indices = @transform_2, window_bounds = array<i64: 8, 128>}, {transform_indices = @transform_3, window_bounds = array<i64: 8, 128>}]} {
    %c0 = arith.constant 0 : index
    %c0_0 = arith.constant 0 : index
    %0 = vector.load %arg1[%c0, %c0_0] : memref<8x16xf32, #tpu.memory_space<vmem>>, vector<8x16xf32>
    %c0_1 = arith.constant 0 : index
    %c0_2 = arith.constant 0 : index
    %1 = vector.load %arg2[%c0_1, %c0_2] : memref<16x128xf32, #tpu.memory_space<vmem>>, vector<16x128xf32>
    %cst = arith.constant dense<0.000000e+00> : vector<8x128xf32>
    %2 = tpu.matmul %0, %1, %cst {dimension_numbers = #tpu.dot_dimension_numbers<[1], [0], [0], [1], [0, 0, 1, 1], [], []>} : vector<8x16xf32>, vector<16x128xf32>, vector<8x128xf32> -> vector<8x128xf32>
    %c0_3 = arith.constant 0 : index
    %c0_4 = arith.constant 0 : index
    %3 = vector.load %arg3[%c0_3, %c0_4] : memref<8x128xf32, #tpu.memory_space<vmem>>, vector<8x128xf32>
    %4 = arith.addf %2, %3 : vector<8x128xf32>
    %c0_5 = arith.constant 0 : index
    %c0_6 = arith.constant 0 : index
    %5 = vector.load %arg4[%c0_5, %c0_6] : memref<8x128xf32, #tpu.memory_space<vmem>>, vector<8x128xf32>
    tpu.vector_store %arg4[%c0_5, %c0_6], %4 {strides = array<i32>} : memref<8x128xf32, #tpu.memory_space<vmem>>, vector<8x128xf32>,
    return
  }
  func.func @transform_0(%arg0: i32) -> (i32, i32) {
    %c0_i32 = arith.constant 0 : i32
    %c0_i32_0 = arith.constant 0 : i32
    return %arg0, %c0_i32 : i32, i32
  }
  func.func @transform_1(%arg0: i32) -> (i32, i32) {
    %c0_i32 = arith.constant 0 : i32
    %c0_i32_0 = arith.constant 0 : i32
    %c0_i32_1 = arith.constant 0 : i32
    return %c0_i32, %c0_i32_0 : i32, i32
  }
  func.func @transform_2(%arg0: i32) -> (i32, i32) {
    %c0_i32 = arith.constant 0 : i32
    %c0_i32_0 = arith.constant 0 : i32
    return %arg0, %c0_i32 : i32, i32
  }
  func.func @transform_3(%arg0: i32) -> (i32, i32) {
    %c0_i32 = arith.constant 0 : i32
    %c0_i32_0 = arith.constant 0 : i32
    return %arg0, %c0_i32 : i32, i32
  }
}

</mosaic_0001>

<bundles_post_ra>
// kernel: tpu_custom_call.1
= control target key start
LH: loop header
LB: loop body
LE: loop exit
PB: predicated region body
PF: predicated region fallthrough
CT: control target
= control target key end

     0   :  { %8 = vsyncpa [#allocation3], 0  ;;  %s341_s0 = inlined_call_operand.hbm [shape: f32[8,16], index: 0, kind: input, shape index: {}]   ;;  %s342_s1 = inlined_call_operand.hbm [shape: f32[16,128], index: 1, kind: input, shape index: {}]   ;;  %s343_s2 = inlined_call_operand.hbm [shape: f32[8,128], index: 2, kind: input, shape index: {}]   ;;  %s344_s3 = inlined_call_operand.hbm [shape: f32[8,128], index: 3, kind: output, shape index: {}]  }
   0x1   :  { %9 = vsyncpa [#allocation6], 0 }
   0x2   :  { %10 = vsyncpa [#allocation4], 0  ;;  %s264_s12 = smov [#allocation5]   ;;  %s170_s16 = scalar_lea.hbm %s342_s1, 256 }
   0x3   :  { %s26_s13 = sshll.u32 %s264_s12, 4  ;;  %p171_p0 = scmp.ne.s32.totalorder %s342_s1, %s170_s16  ;;  %s27_s13 = int_to_ptr.vmem [resolvable:$true] %s26_s13 }
   0x4   :  { %p174_p1 = scmp.lt.u32.totalorder %s170_s16, %s342_s1 }
   0x6   :  { %p176_p2 = pnand %p174_p1, %p171_p0 }
   0x8   :  { %179 = shalt.err (!%p176_p2)
}
   0x9   :  { %s180_s21 = scalar_lea.vmem %s27_s13, 256  ;;  %p185_p4 = scmp.lt.s32.totalorder %s27_s13, %s27_s13 }
   0xa   :  { %p181_p3 = scmp.ne.s32.totalorder %s27_s13, %s180_s21  ;;  %p186_p5 = scmp.lt.s32.totalorder %s180_s21, %s180_s21 }
   0xc   :  { %p187_p6 = por %p186_p5, %p185_p4 }
   0xe   :  { %p188_p7 = pnand %p187_p6, %p181_p3 }
  0x10   :  { %191 = shalt.err (!%p188_p7)
}
  0x11   :  { %s265_s22 = smov 128   ;;  %s266_s23 = smov 8  }
  0x12   :  { %32 = dma.hbm_to_vmem [thread:$0]  %s342_s1, 256, %s27_s13, [#allocation6], %s265_s22, %s265_s22, %s266_s23  }
  0x13   :  { %s267_s26 = smov [#allocation2]   ;;  %s268_s28 = smov [#allocation7]  }
  0x14   :  { %s17_s27 = sshll.u32 %s267_s26, 4  ;;  %s39_s29 = sshll.u32 %s268_s28, 4  ;;  %s18_s27 = int_to_ptr.vmem [resolvable:$true] %s17_s27  ;;  %s40_s29 = int_to_ptr.vmem [resolvable:$true] %s39_s29 }
  0x15   :  { %s192_s5 = scalar_lea.hbm %s341_s0, 128 }
  0x16   :  { %p193_p8 = scmp.ne.s32.totalorder %s341_s0, %s192_s5  ;;  %p196_p9 = scmp.lt.u32.totalorder %s192_s5, %s341_s0 }
  0x18   :  { %p198_p10 = pnand %p196_p9, %p193_p8 }
  0x1a   :  { %201 = shalt.err (!%p198_p10)
}
  0x1b   :  { %s202_s1 = scalar_lea.vmem %s18_s27, 128  ;;  %p207_p12 = scmp.lt.s32.totalorder %s18_s27, %s18_s27 }
  0x1c   :  { %p203_p11 = scmp.ne.s32.totalorder %s18_s27, %s202_s1  ;;  %p208_p13 = scmp.lt.s32.totalorder %s202_s1, %s202_s1 }
  0x1e   :  { %p209_p0 = por %p208_p13, %p207_p12 }
  0x20   :  { %p210_p1 = pnand %p209_p0, %p203_p11 }
  0x22   :  { %213 = shalt.err (!%p210_p1)
}
  0x23   :  { %20 = dma.hbm_to_vmem [thread:$0]  %s341_s0, 128, %s18_s27, [#allocation3]  }
  0x24   :  { %s214_s14 = scalar_lea.hbm %s343_s2, 128 }
  0x25   :  { %p215_p2 = scmp.ne.s32.totalorder %s343_s2, %s214_s14  ;;  %p218_p3 = scmp.lt.u32.totalorder %s214_s14, %s343_s2 }
  0x27   :  { %p220_p4 = pnand %p218_p3, %p215_p2 }
  0x29   :  { %223 = shalt.err (!%p220_p4)
}
  0x2a   :  { %s224_s19 = scalar_lea.vmem %s40_s29, 128  ;;  %p229_p6 = scmp.lt.s32.totalorder %s40_s29, %s40_s29 }
  0x2b   :  { %p225_p5 = scmp.ne.s32.totalorder %s40_s29, %s224_s19  ;;  %p230_p7 = scmp.lt.s32.totalorder %s224_s19, %s224_s19 }
  0x2d   :  { %p231_p8 = por %p230_p7, %p229_p6 }
  0x2f   :  { %p232_p9 = pnand %p231_p8, %p225_p5 }
  0x31   :  { %235 = shalt.err (!%p232_p9)
}
  0x32   :  { %42 = dma.hbm_to_vmem [thread:$0]  %s343_s2, 128, %s40_s29, [#allocation6]  }
  0x33   :  { %258 = dma.done.wait [#allocation3], 128  }
  0x34   :  { %259 = vsyncadd [#allocation3], 4294967168 }
  0x35   :  { %260 = dma.done.wait [#allocation6], 384  }
  0x36   :  { %261 = vsyncadd [#allocation6], 4294966912  ;;  %v269_v0 = vmov 0.0|0.0   ;;  %vm270_vm0 = vmmov 0   ;;  %v271_v1 = vmov 0.0   ;;  %v53_v2 = vld [vmem:[#allocation5] sm:$0xff] }
  0x37   :  { %158 = vmatprep.subr.bf16.mxu0 %v269_v0  ;;  %155 = vmatprep.mubr.msk.f32.mxu0 %vm270_vm0, %v271_v1  ;;  %v54_v3 = vld [vmem:[#allocation5 + $0x8] sm:$0xff]  ;;  %v52_v5 = vld [vmem:[#allocation2] sm:$0xff]  ;;  %vm56_vm1 = vcmask 130048   ;;  %v55_v6 = vld [vmem:[#allocation7] sm:$0xff]  ;;  %s272_s21 = smov [#allocation8]  }
  0x38   :  { %v159_v4 = vpack.c.bf16 %v54_v3, %v53_v2  ;;  %s137_s22 = sshll.u32 %s272_s21, 4  ;;  %s138_s22 = int_to_ptr.vmem [resolvable:$true] %s137_s22 }
  0x39   :  { %s236_s2 = scalar_lea.vmem %s138_s22, 128  ;;  %p241_p11 = scmp.lt.s32.totalorder %s138_s22, %s138_s22 }
  0x3a   :  { %160 = vmatpush3.bf16.msra.mxu0 %v159_v4  ;;  %p237_p10 = scmp.ne.s32.totalorder %s138_s22, %s236_s2  ;;  %p242_p12 = scmp.lt.s32.totalorder %s236_s2, %s236_s2 }
  0x3c   :  { %p243_p13 = por %p242_p12, %p241_p11 }
  0x3d   :  { %156 = vmatmul.mubr.msk.f32.vlgmr.msra.gmra.mrb[0].mxu0 %vm56_vm1, %v52_v5 }
  0x3e   :  { %p244_p0 = pnand %p243_p13, %p237_p10 }
 0x110   :  { %v126_v7 = vpop.f32.mrb[0].mxu0 }
 0x111   :  { %v127_v8 = vadd.f32 %v126_v7, %v55_v6  ;;  %v157_v9 = vpop.f32.mrb[1].mxu0 }
 0x113   :  { %130 = vst [vmem:[#allocation8] sm:$0xff] %v127_v8 }
 0x114   :  { %247 = shalt.err (!%p244_p0)
}
 0x115   :  { %s248_s25 = scalar_lea.hbm %s344_s3, 128 }
 0x116   :  { %p249_p1 = scmp.ne.s32.totalorder %s344_s3, %s248_s25  ;;  %p252_p2 = scmp.lt.u32.totalorder %s248_s25, %s344_s3 }
 0x118   :  { %p254_p3 = pnand %p252_p2, %p249_p1 }
 0x11a   :  { %257 = shalt.err (!%p254_p3)
}
 0x11b   :  { %140 = dma.vmem_to_hbm [thread:$0]  %s138_s22, 128, %s344_s3, [#allocation4]  }
 0x11c   :  { %262 = dma.done.wait [#allocation4], 128  }
 0x11d   :  { %263 = vsyncadd [#allocation4], 4294967168 }
 0x11e   :  { %144 = vsyncpa [#allocation3], 1 }
 0x11f   :  { %145 = vsyncpa [#allocation6], 1 }
 0x120   :  { %146 = vsyncpa [#allocation4], 1 }

</bundles_post_ra>
